<compile_context>
chip_gen: v6e
topology: v6e:2x2x1
jax: 0.10.0
libtpu: 0.0.40
codegen_flags: <defaults>
</compile_context>

<pallas_src>
import functools

import jax
import jax.numpy as jnp
import numpy as np
from jax import lax
from jax.experimental import pallas as pl
from jax.experimental.pallas import tpu as pltpu

EPS = 1e-5  # nn.BatchNorm2d default eps


def _pad_to(n, m):
    return ((n + m - 1) // m) * m


def _apply_act(y, act):
    if act == "none":
        return y
    if act == "leaky":                      # nn.LeakyReLU(0.2)
        return jnp.where(y > 0, y, 0.2 * y)
    if act == "relu":
        return jnp.maximum(y, 0.0)
    if act == "tanh":
        return jnp.tanh(y)
    raise ValueError(act)


@functools.lru_cache(maxsize=1)
def _vmem_limit_bytes():
    cap = 128 * 1024 * 1024
    try:
        cap = int(getattr(pltpu.get_tpu_info(), "vmem_capacity_bytes", cap))
    except Exception:  # interpret mode / non-TPU fallback
        pass
    # leave headroom; v7x only has 64 MiB per TensorCore.
    return int(min(cap * 3 // 4, 96 * 1024 * 1024))


# --------------------- fused conv-as-matmul Pallas kernel ---------------------

def _conv_mm_kernel(*refs, apply_in, act_in, has_out_bias, act_out, multi_k):
    """o = act_out(dot(act_in(a*si+bi), b) + bo), K-tiled into acc when multi_k."""
    if multi_k:
        acc_ref = refs[-1]
        refs = refs[:-1]
    o_ref = refs[-1]
    ins = refs[:-1]
    a_ref, b_ref = ins[0], ins[1]
    pos = 2
    if apply_in:
        si_ref, bi_ref = ins[pos], ins[pos + 1]
        pos += 2
    if has_out_bias:
        bo_ref = ins[pos]
        pos += 1

    a = a_ref[...]
    if apply_in or act_in != "none":
        af = a.astype(jnp.float32)
        if apply_in:
            af = af * si_ref[...] + bi_ref[...]      # deferred BN affine (per K col)
        a = _apply_act(af, act_in).astype(b_ref.dtype)

    part = jnp.dot(a, b_ref[...], preferred_element_type=jnp.float32)

    def _finish(y):
        if has_out_bias:
            y = y + bo_ref[...]                      # conv bias
        return _apply_act(y, act_out).astype(o_ref.dtype)

    if multi_k:
        @pl.when(pl.program_id(2) == 0)
        def _():
            acc_ref[...] = jnp.zeros_like(acc_ref)

        acc_ref[...] += part

        @pl.when(pl.program_id(2) == pl.num_programs(2) - 1)
        def _():
            o_ref[...] = _finish(acc_ref[...])
    else:
        # single-K fast path: no accumulator scratch, write the tile directly.
        o_ref[...] = _finish(part)


def fused_conv_matmul(a, b, in_scale=None, in_bias=None, out_bias=None,
                      act_in="none", act_out="none", out_dtype=jnp.float32):
    """act_out((act_in(a*in_scale+in_bias) @ b) + out_bias).

    a: (M, K) patches, b: (K, N) weights; per-column affines broadcast over rows.
    """
    M, K = a.shape
    Kb, Ncols = b.shape
    assert K == Kb
    apply_in = (in_scale is not None) or (in_bias is not None)
    has_out_bias = out_bias is not None

    # Lane-dense output: pad N to a multiple of 128 (256-wide tiles when possible).
    Np = _pad_to(Ncols, 128)
    tn = 256 if Np % 256 == 0 else 128
    itemsize = jnp.dtype(a.dtype).itemsize
    tm_cap = 512 if itemsize <= 2 else 256
    tm = min(tm_cap, _pad_to(M, 8))
    Mp = _pad_to(M, tm)

    # K tiling: keep a single K tile as long as it fits comfortably in VMEM.
    k_single_max = 8192 if itemsize <= 2 else 4096
    if K <= k_single_max:
        tk, Kp = K, K
    else:
        tk = 2048
        Kp = _pad_to(K, tk)

    # v7x megacore: avoid a degenerate (1,1,K) grid on the deep layers.
    if Mp // tm == 1 and Np // tn == 1 and tn > 128:
        tn = 128

    if (Mp, Kp) != (M, K):
        a = jnp.pad(a, ((0, Mp - M), (0, Kp - K)))
    if (Kp, Np) != (K, Ncols):
        b = jnp.pad(b, ((0, Kp - K), (0, Np - Ncols)))  # zero K rows keep acc exact

    def _vec(v, default, n, n_pad):
        if v is None:
            v = jnp.full((n,), default, jnp.float32)
        v = v.astype(jnp.float32)
        if n_pad != n:
            v = jnp.pad(v, (0, n_pad - n), constant_values=default)
        return v.reshape(1, n_pad)

    operands = [a, b]
    in_specs = [
        pl.BlockSpec((tm, tk), lambda j, i, k: (i, k)),
        pl.BlockSpec((tk, tn), lambda j, i, k: (k, j)),
    ]
    if apply_in:
        operands += [_vec(in_scale, 1.0, K, Kp), _vec(in_bias, 0.0, K, Kp)]
        in_specs += [pl.BlockSpec((1, tk), lambda j, i, k: (0, k)),
                     pl.BlockSpec((1, tk), lambda j, i, k: (0, k))]
    if has_out_bias:
        operands += [_vec(out_bias, 0.0, Ncols, Np)]
        in_specs += [pl.BlockSpec((1, tn), lambda j, i, k: (0, j))]

    kt = Kp // tk
    multi_k = kt > 1
    # Grid order (N-tiles outer, M-tiles inner): with a single K tile the B
    # (weight) block index is constant across the inner axis, so the weight
    # panel is DMA'd once per N tile instead of once per (M,N) tile.
    grid = (Np // tn, Mp // tm, kt)
    scratch = [pltpu.VMEM((tm, tn), jnp.float32)] if multi_k else []

    cost = pl.CostEstimate(
        flops=2 * Mp * Kp * Np,
        transcendentals=Mp * Np if act_out == "tanh" else 0,
        bytes_accessed=(a.size * a.dtype.itemsize + b.size * b.dtype.itemsize
                        + Mp * Np * jnp.dtype(out_dtype).itemsize),
    )
    out = pl.pallas_call(
        functools.partial(_conv_mm_kernel, apply_in=apply_in, act_in=act_in,
                          has_out_bias=has_out_bias, act_out=act_out,
                          multi_k=multi_k),
        out_shape=jax.ShapeDtypeStruct((Mp, Np), out_dtype),
        grid=grid,
        in_specs=in_specs,
        out_specs=pl.BlockSpec((tm, tn), lambda j, i, k: (i, j)),
        scratch_shapes=scratch,
        compiler_params=pltpu.CompilerParams(
            dimension_semantics=("parallel", "parallel", "arbitrary"),
            vmem_limit_bytes=_vmem_limit_bytes()),
        cost_estimate=cost,
    )(*operands)
    return out[:M, :Ncols]


# ------------------------ BatchNorm statistics kernel -------------------------

def _bn_stats_kernel(y_ref, sum_ref, ssq_ref):
    @pl.when(pl.program_id(0) == 0)
    def _():
        sum_ref[...] = jnp.zeros_like(sum_ref)
        ssq_ref[...] = jnp.zeros_like(ssq_ref)
    y = y_ref[...].astype(jnp.float32)
    sum_ref[...] += jnp.sum(y, axis=0, keepdims=True)
    ssq_ref[...] += jnp.sum(y * y, axis=0, keepdims=True)


def pallas_bn_stats(y2d):
    """Per-channel batch mean / biased variance of a (M, C) channel-last array."""
    M, C = y2d.shape
    tm = min(512, _pad_to(M, 8))
    Mp = _pad_to(M, tm)
    if Mp != M:
        y2d = jnp.pad(y2d, ((0, Mp - M), (0, 0)))   # zero rows add 0 to sums
    s, ss = pl.pallas_call(
        _bn_stats_kernel,
        out_shape=(jax.ShapeDtypeStruct((1, C), jnp.float32),
                   jax.ShapeDtypeStruct((1, C), jnp.float32)),
        grid=(Mp // tm,),
        in_specs=[pl.BlockSpec((tm, C), lambda i: (i, 0))],
        out_specs=[pl.BlockSpec((1, C), lambda i: (0, 0)),
                   pl.BlockSpec((1, C), lambda i: (0, 0))],
        compiler_params=pltpu.CompilerParams(dimension_semantics=("arbitrary",)),
    )(y2d)
    mean = s[0] / M
    var = ss[0] / M - mean * mean
    return mean, var


def bn_deferred(y_nhwc, gamma, beta):
    """Compute train-mode batch-norm affine and attach it as a pending affine."""
    C = y_nhwc.shape[-1]
    mean, var = pallas_bn_stats(y_nhwc.reshape(-1, C))
    scale = gamma.astype(jnp.float32) * lax.rsqrt(var + EPS)
    bias = beta.astype(jnp.float32) - mean * scale
    return dict(x=y_nhwc, scale=scale, bias=bias)


# ---------------------- NHWC im2col + conv layer wrappers ----------------------

def _neutral_pad_value(t):
    """Per-channel value v with scale*v + bias == 0, so padded taps vanish."""
    if t["scale"] is None and t["bias"] is None:
        return None
    C = t["x"].shape[-1]
    s = (jnp.ones((C,), jnp.float32) if t["scale"] is None
         else t["scale"].astype(jnp.float32))
    b = (jnp.zeros((C,), jnp.float32) if t["bias"] is None
         else t["bias"].astype(jnp.float32))
    safe = jnp.where(s == 0, 1.0, s)
    return jnp.where(s == 0, 0.0, -b / safe)


def _pad_hw1(x, pad_val):
    """Pad H,W by 1 with zeros or with a per-channel neutral value."""
    N, H, W, C = x.shape
    if pad_val is None:
        return jnp.pad(x, ((0, 0), (1, 1), (1, 1), (0, 0)))
    pv = pad_val.astype(x.dtype).reshape(1, 1, 1, C)
    xp = jnp.broadcast_to(pv, (N, H + 2, W + 2, C))
    return xp.at[:, 1:H + 1, 1:W + 1, :].set(x)


def _im2col_s2_k4(x, pad_val=None):            # Conv2d k=4 s=2 p=1, NHWC
    N, H, W, C = x.shape
    Ho, Wo = H // 2, W // 2
    xp = _pad_hw1(x, pad_val)
    cols = []
    for i in range(4):
        for j in range(4):
            cols.append(xp[:, i:i + 2 * Ho:2, j:j + 2 * Wo:2, :])
    p = jnp.stack(cols, axis=3)                 # (N, Ho, Wo, 16, C)
    return p.reshape(N * Ho * Wo, 16 * C), Ho, Wo


def _im2col_s1_k3(x, pad_val=None):            # 3x3 stride-1 patches, pad=1, NHWC
    N, H, W, C = x.shape
    xp = _pad_hw1(x, pad_val)
    cols = []
    for r in range(3):
        for s in range(3):
            cols.append(xp[:, r:r + H, s:s + W, :])
    p = jnp.stack(cols, axis=3)                 # (N, H, W, 9, C)
    return p.reshape(N * H * W, 9 * C)


def _upconv_weight_mat(w_iohw):
    """ConvTranspose2d(4,2,1) as 4 output phases over 3x3 patches: (9*Cin, 4*Cout)."""
    Cin, Cout = w_iohw.shape[0], w_iohw.shape[1]
    wf = jnp.flip(w_iohw, axis=(2, 3)).transpose(2, 3, 0, 1)   # (4,4,Cin,Cout)
    W3 = jnp.zeros((3, 3, Cin, 2, 2, Cout), w_iohw.dtype)
    for p in range(2):
        for q in range(2):
            for t in range(2):
                for u in range(2):
                    W3 = W3.at[p + t, q + u, :, p, q, :].set(wf[p + 2 * t, q + 2 * u])
    return W3.reshape(9 * Cin, 4 * Cout)


def _in_affine(t, reps):
    si = None if t["scale"] is None else jnp.tile(t["scale"].astype(jnp.float32), reps)
    bi = None if t["bias"] is None else jnp.tile(t["bias"].astype(jnp.float32), reps)
    return si, bi


def conv_down_raw(t, w_oihw, act_in, compute_dtype):
    """act_in(pending_affine(x)) -> Conv2d(4,2,1,bias=False); returns raw NHWC output."""
    x = t["x"]
    N, H, W, Cin = x.shape
    Cout = w_oihw.shape[0]
    patches, Ho, Wo = _im2col_s2_k4(x, _neutral_pad_value(t))
    wmat = w_oihw.transpose(2, 3, 1, 0).reshape(16 * Cin, Cout).astype(compute_dtype)
    si, bi = _in_affine(t, 16)
    y = fused_conv_matmul(patches.astype(compute_dtype), wmat, in_scale=si, in_bias=bi,
                          act_in=act_in, act_out="none", out_dtype=compute_dtype)
    return y.reshape(N, Ho, Wo, Cout)


def conv_up_raw(t, w_iohw, act_in, out_bias, act_out, compute_dtype):
    """act_in(pending_affine(x)) -> ConvTranspose2d(4,2,1) (+bias, act_out fused)."""
    x = t["x"]
    N, H, W, Cin = x.shape
    Cout = w_iohw.shape[1]
    patches = _im2col_s1_k3(x, _neutral_pad_value(t))
    wmat = _upconv_weight_mat(w_iohw).astype(compute_dtype)     # (9*Cin, 4*Cout)
    si, bi = _in_affine(t, 9)
    ob = None if out_bias is None else jnp.tile(out_bias.astype(jnp.float32), 4)
    y = fused_conv_matmul(patches.astype(compute_dtype), wmat, in_scale=si, in_bias=bi,
                          out_bias=ob, act_in=act_in, act_out=act_out,
                          out_dtype=compute_dtype)
    # TODO(synk): the 2x2 phase de-interleave below is a plain XLA transpose
    # (one extra HBM pass per up layer); folding it into the consumer's im2col
    # is left for a follow-up together with in-kernel patch construction.
    y = y.reshape(N, H, W, 2, 2, Cout).transpose(0, 1, 3, 2, 4, 5)
    return y.reshape(N, 2 * H, 2 * W, Cout)


def _concat_t(t1, t2):
    x = jnp.concatenate([t1["x"], t2["x"]], axis=-1)
    if all(t[k] is None for t in (t1, t2) for k in ("scale", "bias")):
        return dict(x=x, scale=None, bias=None)

    def get(t, key, default):
        C = t["x"].shape[-1]
        v = t[key]
        return jnp.full((C,), default, jnp.float32) if v is None else v.astype(jnp.float32)

    return dict(x=x,
                scale=jnp.concatenate([get(t1, "scale", 1.0), get(t2, "scale", 1.0)]),
                bias=jnp.concatenate([get(t1, "bias", 0.0), get(t2, "bias", 0.0)]))


# ------------------------------ UnetBlock / Unet ------------------------------

def unet_block_forward(p, t, compute_dtype):
    if p["outermost"]:
        d = conv_down_raw(t, p["down_w"], act_in="none", compute_dtype=compute_dtype)
        s = unet_block_forward(p["sub"], dict(x=d, scale=None, bias=None), compute_dtype)
        return conv_up_raw(s, p["up_w"], act_in="relu", out_bias=p["up_bias"],
                           act_out="tanh", compute_dtype=compute_dtype)
    if p["innermost"]:
        d = conv_down_raw(t, p["down_w"], act_in="leaky", compute_dtype=compute_dtype)
        u = conv_up_raw(dict(x=d, scale=None, bias=None), p["up_w"], act_in="relu",
                        out_bias=None, act_out="none", compute_dtype=compute_dtype)
        u_t = bn_deferred(u, p["up_g"], p["up_b"])
        return _concat_t(t, u_t)
    d = conv_down_raw(t, p["down_w"], act_in="leaky", compute_dtype=compute_dtype)
    d_t = bn_deferred(d, p["down_g"], p["down_b"])
    s = unet_block_forward(p["sub"], d_t, compute_dtype)
    u = conv_up_raw(s, p["up_w"], act_in="relu", out_bias=None, act_out="none",
                    compute_dtype=compute_dtype)
    u_t = bn_deferred(u, p["up_g"], p["up_b"])
    # TODO(synk): nn.Dropout(0.5) is stochastic in train mode; treated as
    # inference-mode identity here when p["dropout"] is True.
    return _concat_t(t, u_t)


def unet_forward(params, x_nchw, compute_dtype=jnp.bfloat16):
    x = x_nchw.transpose(0, 2, 3, 1).astype(compute_dtype)     # NCHW -> NHWC
    y = unet_block_forward(params, dict(x=x, scale=None, bias=None), compute_dtype)
    return y.transpose(0, 3, 1, 2).astype(jnp.float32)         # NHWC -> NCHW


# -------------------------------- parameters ----------------------------------

def _make_block(key, nf, ni, sub=None, input_c=None, dropout=False,
                innermost=False, outermost=False):
    if input_c is None:
        input_c = nf
    k0, k1, k2, k3, k4, k5 = jax.random.split(key, 6)
    p = {"outermost": outermost, "innermost": innermost, "dropout": dropout, "sub": sub}
    p["down_w"] = 0.1 * jax.random.normal(k0, (ni, input_c, 4, 4), jnp.float32)
    if not (innermost or outermost):
        p["down_g"] = 1.0 + 0.1 * jax.random.normal(k1, (ni,), jnp.float32)
        p["down_b"] = 0.1 * jax.random.normal(k2, (ni,), jnp.float32)
    up_in = ni if innermost else ni * 2
    p["up_w"] = 0.1 * jax.random.normal(k3, (up_in, nf, 4, 4), jnp.float32)
    if outermost:
        p["up_bias"] = 0.1 * jax.random.normal(k4, (nf,), jnp.float32)
    else:
        p["up_g"] = 1.0 + 0.1 * jax.random.normal(k4, (nf,), jnp.float32)
        p["up_b"] = 0.1 * jax.random.normal(k5, (nf,), jnp.float32)
    return p


def init_unet_params(key, input_c=1, output_c=2, n_down=8, num_filters=64):
    keys = iter(jax.random.split(key, n_down + 2))
    block = _make_block(next(keys), num_filters * 8, num_filters * 8, innermost=True)
    for _ in range(n_down - 5):
        block = _make_block(next(keys), num_filters * 8, num_filters * 8, sub=block, dropout=True)
    out_filters = num_filters * 8
    for _ in range(3):
        block = _make_block(next(keys), out_filters // 2, out_filters, sub=block)
        out_filters //= 2
    return _make_block(next(keys), output_c, out_filters, input_c=input_c,
                       sub=block, outermost=True)


# ------------------------- pure-lax reference (NCHW) ---------------------------

_PREC = lax.Precision.HIGHEST


def _ref_conv(x, w):
    return lax.conv_general_dilated(x, w, window_strides=(2, 2), padding=((1, 1), (1, 1)),
                                    dimension_numbers=("NCHW", "OIHW", "NCHW"),
                                    precision=_PREC)


def _ref_convT(x, w_iohw):
    wf = jnp.flip(w_iohw, axis=(2, 3)).transpose(1, 0, 2, 3)
    return lax.conv_general_dilated(x, wf, window_strides=(1, 1), padding=((2, 2), (2, 2)),
                                    lhs_dilation=(2, 2),
                                    dimension_numbers=("NCHW", "OIHW", "NCHW"),
                                    precision=_PREC)


def _ref_bn(x, g, b):
    mean = x.mean(axis=(0, 2, 3), keepdims=True)
    var = ((x - mean) ** 2).mean(axis=(0, 2, 3), keepdims=True)
    return (x - mean) * lax.rsqrt(var + EPS) * g[None, :, None, None] + b[None, :, None, None]


def _leaky(x):
    return jnp.where(x > 0, x, 0.2 * x)


def ref_forward(p, x):
    if p["outermost"]:
        d = _ref_conv(x, p["down_w"])
        s = ref_forward(p["sub"], d)
        u = _ref_convT(jax.nn.relu(s), p["up_w"]) + p["up_bias"][None, :, None, None]
        return jnp.tanh(u)
    if p["innermost"]:
        d = _ref_conv(_leaky(x), p["down_w"])
        u = _ref_bn(_ref_convT(jax.nn.relu(d), p["up_w"]), p["up_g"], p["up_b"])
        return jnp.concatenate([x, u], axis=1)
    d = _ref_bn(_ref_conv(_leaky(x), p["down_w"]), p["down_g"], p["down_b"])
    s = ref_forward(p["sub"], d)
    u = _ref_bn(_ref_convT(jax.nn.relu(s), p["up_w"]), p["up_g"], p["up_b"])
    return jnp.concatenate([x, u], axis=1)


# ------------------------------------ main -------------------------------------

if __name__ == "__main__":
    # Small configuration consistent with the module: Unet(input_c=1, output_c=2,
    # n_down=5, num_filters=8); spatial size must be >= 2**n_down = 32.
    INPUT_C, OUTPUT_C, N_DOWN, NUM_FILTERS = 1, 2, 5, 8
    BATCH, SPATIAL = 2, 32

    root = jax.random.PRNGKey(0)
    k_param, k_x, k_unit = jax.random.split(root, 3)

    # ---------------- precision-robust unit checks (tight) ----------------
    ku = jax.random.split(k_unit, 8)

    # (a) Conv2d(4,2,1) consuming a deferred BN affine + LeakyReLU (the exact
    #     configuration whose border handling was wrong in the previous rev).
    xu = jax.random.normal(ku[0], (2, 8, 8, 16), jnp.float32)
    wdn = 0.1 * jax.random.normal(ku[1], (32, 16, 4, 4), jnp.float32)
    sc = 1.0 + 0.1 * jax.random.normal(ku[2], (16,), jnp.float32)
    bi = 0.5 * jax.random.normal(ku[3], (16,), jnp.float32)
    td = dict(x=xu, scale=sc, bias=bi)
    yd = conv_down_raw(td, wdn, act_in="leaky", compute_dtype=jnp.float32)
    yd_ref = _ref_conv(_leaky(xu * sc + bi).transpose(0, 3, 1, 2), wdn).transpose(0, 2, 3, 1)
    np.testing.assert_allclose(np.asarray(yd), np.asarray(yd_ref), atol=5e-2, rtol=5e-2)

    # (b) ConvTranspose2d(4,2,1) consuming a deferred affine, + bias + Tanh.
    xu2 = jax.random.normal(ku[4], (2, 4, 4, 16), jnp.float32)
    wup = 0.1 * jax.random.normal(ku[5], (16, 8, 4, 4), jnp.float32)
    obu = 0.1 * jax.random.normal(ku[6], (8,), jnp.float32)
    tu = dict(x=xu2, scale=sc, bias=bi)
    yu = conv_up_raw(tu, wup, act_in="relu", out_bias=obu, act_out="tanh",
                     compute_dtype=jnp.float32)
    yu_ref = jnp.tanh(
        _ref_convT(jax.nn.relu(xu2 * sc + bi).transpose(0, 3, 1, 2), wup)
        + obu[None, :, None, None]).transpose(0, 2, 3, 1)
    np.testing.assert_allclose(np.asarray(yu), np.asarray(yu_ref), atol=5e-2, rtol=5e-2)

    # (c) BatchNorm batch statistics.
    yb = 1.0 + 2.0 * jax.random.normal(ku[7], (2, 4, 4, 32), jnp.float32)
    yb2 = yb.reshape(-1, 32)
    m_p, v_p = pallas_bn_stats(yb2)
    np.testing.assert_allclose(np.asarray(m_p), np.asarray(jnp.mean(yb2, axis=0)),
                               atol=1e-3, rtol=1e-3)
    np.testing.assert_allclose(np.asarray(v_p), np.asarray(jnp.var(yb2, axis=0)),
                               atol=1e-3, rtol=1e-3)

    # ------------------------------ end-to-end ------------------------------
    params = init_unet_params(k_param, input_c=INPUT_C, output_c=OUTPUT_C,
                              n_down=N_DOWN, num_filters=NUM_FILTERS)
    x = jax.random.normal(k_x, (BATCH, INPUT_C, SPATIAL, SPATIAL), jnp.float32)

    fwd_bf16 = jax.jit(lambda xx: unet_forward(params, xx, compute_dtype=jnp.bfloat16))
    fwd_f32 = jax.jit(lambda xx: unet_forward(params, xx, compute_dtype=jnp.float32))
    ref_fn = jax.jit(lambda xx: ref_forward(params, xx))

    y = jax.block_until_ready(fwd_bf16(x))
    assert y.shape == (BATCH, OUTPUT_C, SPATIAL, SPATIAL), y.shape
    assert bool(jnp.all(jnp.isfinite(y)))

    y32 = jax.block_until_ready(fwd_f32(x))
    yref = jax.block_until_ready(ref_fn(x))

    # Loose end-to-end bounds: structural bugs show up as O(1) deviations on a
    # tanh output, while matmul-precision noise amplified through ~8 train-mode
    # BatchNorm layers stays well below these. Tight per-primitive checks above.
    err32 = float(jnp.max(jnp.abs(y32 - yref)))
    errbf = float(jnp.max(jnp.abs(y.astype(jnp.float32) - yref)))
    if err32 > 0.30:
        raise AssertionError("f32 Pallas vs lax reference mismatch: max|diff|=%e" % err32)
    if errbf > 0.50:
        raise AssertionError("bf16 Pallas vs lax reference mismatch: max|diff|=%e" % errbf)

    print("KERNEL_OK")
</pallas_src>

<mosaic_0001>
module attributes {stable_mosaic.version = 11 : i64} {
  func.func @_conv_mm_kernel(%arg0: i32, %arg1: i32, %arg2: i32, %arg3: memref<32x256xf32, #tpu.memory_space<vmem>>, %arg4: memref<256x128xf32, #tpu.memory_space<vmem>>, %arg5: memref<1x256xf32, #tpu.memory_space<vmem>>, %arg6: memref<1x256xf32, #tpu.memory_space<vmem>>, %arg7: memref<32x128xf32, #tpu.memory_space<vmem>>) attributes {dimension_semantics = [#tpu.dimension_semantics<parallel>, #tpu.dimension_semantics<parallel>, #tpu.dimension_semantics<arbitrary>], iteration_bounds = array<i64: 1, 1, 1>, scalar_prefetch = 0 : i64, scratch_operands = 0 : i64, tpu.core_type = #tpu.core_type<tc>, window_params = [{transform_indices = @transform_0, window_bounds = array<i64: 32, 256>}, {transform_indices = @transform_1, window_bounds = array<i64: 256, 128>}, {transform_indices = @transform_2, window_bounds = array<i64: 1, 256>}, {transform_indices = @transform_3, window_bounds = array<i64: 1, 256>}, {transform_indices = @transform_4, window_bounds = array<i64: 32, 128>}]} {
    %c0 = arith.constant 0 : index
    %c0_0 = arith.constant 0 : index
    %0 = vector.load %arg3[%c0, %c0_0] : memref<32x256xf32, #tpu.memory_space<vmem>>, vector<32x256xf32>
    %c0_1 = arith.constant 0 : index
    %c0_2 = arith.constant 0 : index
    %1 = vector.load %arg5[%c0_1, %c0_2] : memref<1x256xf32, #tpu.memory_space<vmem>>, vector<1x256xf32>
    %2 = vector.broadcast %1 : vector<1x256xf32> to vector<32x256xf32>
    %3 = arith.mulf %0, %2 : vector<32x256xf32>
    %c0_3 = arith.constant 0 : index
    %c0_4 = arith.constant 0 : index
    %4 = vector.load %arg6[%c0_3, %c0_4] : memref<1x256xf32, #tpu.memory_space<vmem>>, vector<1x256xf32>
    %5 = vector.broadcast %4 : vector<1x256xf32> to vector<32x256xf32>
    %6 = arith.addf %3, %5 : vector<32x256xf32>
    %cst = arith.constant 0.000000e+00 : f32
    %7 = vector.broadcast %cst : f32 to vector<32x256xf32>
    %8 = arith.cmpf ogt, %6, %7 : vector<32x256xf32>
    %cst_5 = arith.constant 2.000000e-01 : f32
    %9 = vector.broadcast %cst_5 : f32 to vector<32x256xf32>
    %10 = arith.mulf %9, %6 : vector<32x256xf32>
    %11 = arith.select %8, %6, %10 : vector<32x256xi1>, vector<32x256xf32>
    %c0_6 = arith.constant 0 : index
    %c0_7 = arith.constant 0 : index
    %12 = vector.load %arg4[%c0_6, %c0_7] : memref<256x128xf32, #tpu.memory_space<vmem>>, vector<256x128xf32>
    %cst_8 = arith.constant dense<0.000000e+00> : vector<32x128xf32>
    %13 = tpu.matmul %11, %12, %cst_8 {dimension_numbers = #tpu.dot_dimension_numbers<[1], [0], [0], [1], [0, 0, 1, 1], [], []>} : vector<32x256xf32>, vector<256x128xf32>, vector<32x128xf32> -> vector<32x128xf32>
    %c0_9 = arith.constant 0 : index
    %c0_10 = arith.constant 0 : index
    %14 = vector.load %arg7[%c0_9, %c0_10] : memref<32x128xf32, #tpu.memory_space<vmem>>, vector<32x128xf32>
    tpu.vector_store %arg7[%c0_9, %c0_10], %13 {strides = array<i32>} : memref<32x128xf32, #tpu.memory_space<vmem>>, vector<32x128xf32>,
    return
  }
  func.func @transform_0(%arg0: i32, %arg1: i32, %arg2: i32) -> (i32, i32) {
    %c0_i32 = arith.constant 0 : i32
    return %arg1, %arg2 : i32, i32
  }
  func.func @transform_1(%arg0: i32, %arg1: i32, %arg2: i32) -> (i32, i32) {
    %c0_i32 = arith.constant 0 : i32
    return %arg2, %arg0 : i32, i32
  }
  func.func @transform_2(%arg0: i32, %arg1: i32, %arg2: i32) -> (i32, i32) {
    %c0_i32 = arith.constant 0 : i32
    %c0_i32_0 = arith.constant 0 : i32
    return %c0_i32, %arg2 : i32, i32
  }
  func.func @transform_3(%arg0: i32, %arg1: i32, %arg2: i32) -> (i32, i32) {
    %c0_i32 = arith.constant 0 : i32
    %c0_i32_0 = arith.constant 0 : i32
    return %c0_i32, %arg2 : i32, i32
  }
  func.func @transform_4(%arg0: i32, %arg1: i32, %arg2: i32) -> (i32, i32) {
    %c0_i32 = arith.constant 0 : i32
    return %arg1, %arg0 : i32, i32
  }
}

</mosaic_0001>

<bundles_post_ra>
// kernel: tpu_custom_call.1
= control target key start
LH: loop header
LB: loop body
LE: loop exit
PB: predicated region body
PF: predicated region fallthrough
CT: control target
= control target key end

     0   :  { %9 = vsyncpa [#allocation3], 0  ;;  %s461_s0 = inlined_call_operand.hbm [shape: f32[32,256], index: 0, kind: input, shape index: {}]   ;;  %s462_s1 = inlined_call_operand.hbm [shape: f32[256,128], index: 1, kind: input, shape index: {}]   ;;  %s463_s2 = inlined_call_operand.vmem [shape: f32[1,256], index: 2, kind: input, shape index: {}]   ;;  %s464_s3 = inlined_call_operand.vmem [shape: f32[1,256], index: 3, kind: input, shape index: {}]   ;;  %s465_s4 = inlined_call_operand.hbm [shape: f32[32,128], index: 4, kind: output, shape index: {}]  }
   0x1   :  { %10 = vsyncpa [#allocation6], 0 }
   0x2   :  { %11 = vsyncpa [#allocation4], 0  ;;  %s406_s15 = smov [#allocation2]  }
   0x3   :  { %s17_s16 = sshll.u32 %s406_s15, 4  ;;  %s18_s16 = int_to_ptr.vmem [resolvable:$true] %s17_s16 }
   0x4   :  { %s348_s17 = scalar_lea.vmem %s18_s16, 1024  ;;  %p353_p1 = scmp.lt.s32.totalorder %s18_s16, %s18_s16 }
   0x5   :  { %p349_p0 = scmp.ne.s32.totalorder %s18_s16, %s348_s17  ;;  %p354_p2 = scmp.lt.s32.totalorder %s348_s17, %s348_s17 }
   0x7   :  { %p355_p3 = por %p354_p2, %p353_p1 }
   0x9   :  { %p356_p4 = pnand %p355_p3, %p349_p0 }
   0xb   :  { %359 = shalt.err (!%p356_p4)
}
   0xc   :  { %s407_s18 = smov 256   ;;  %s408_s19 = smov 16  }
   0xd   :  { %23 = dma.hbm_to_vmem [thread:$0]  %s461_s0, 1024, %s18_s16, [#allocation3], %s407_s18, %s407_s18, %s408_s19  }
   0xe   :  { %s409_s22 = smov [#allocation5]  }
   0xf   :  { %s29_s23 = sshll.u32 %s409_s22, 4  ;;  %s30_s23 = int_to_ptr.vmem [resolvable:$true] %s29_s23 }
  0x10   :  { %s368_s24 = scalar_lea.vmem %s30_s23, 4096  ;;  %p373_p6 = scmp.lt.s32.totalorder %s30_s23, %s30_s23 }
  0x11   :  { %p369_p5 = scmp.ne.s32.totalorder %s30_s23, %s368_s24  ;;  %p374_p7 = scmp.lt.s32.totalorder %s368_s24, %s368_s24 }
  0x13   :  { %p375_p8 = por %p374_p7, %p373_p6 }
  0x15   :  { %p376_p9 = pnand %p375_p8, %p369_p5 }
  0x17   :  { %379 = shalt.err (!%p376_p9)
}
  0x18   :  { %s410_s25 = smov 128   ;;  %s411_s26 = smov 8  }
  0x19   :  { %35 = dma.hbm_to_vmem [thread:$0]  %s462_s1, 4096, %s30_s23, [#allocation6], %s410_s25, %s410_s25, %s411_s26  }
  0x1a   :  { %400 = dma.done.wait [#allocation3], 1024  }
  0x1b   :  { %401 = vsyncadd [#allocation3], 4294966272 }
  0x1c   :  { %402 = dma.done.wait [#allocation6], 4096  }
  0x1d   :  { %403 = vsyncadd [#allocation6], 4294963200  ;;  %v149_v0 = vld [vmem:[#allocation5 + $0xf8] sm:$0xff]  ;;  %v148_v2 = vld [vmem:[#allocation5 + $0xf0] sm:$0xff]  ;;  %v56_v5 = vlaneseq }
  0x1e   :  { %v133_v1 = vld [vmem:[#allocation5 + $0x78] sm:$0xff]  ;;  %257 = vmatprep.subr.mxu0 %v149_v0  ;;  %301 = vmatprep.subr.mxu1 %v149_v0  ;;  %v132_v3 = vld [vmem:[#allocation5 + $0x70] sm:$0xff]  ;;  %v147_v4 = vld [vmem:[#allocation5 + $0xe8] sm:$0xff] }
  0x1f   :  { %258 = vmatpush3.msra.mxu0 %v133_v1  ;;  %317 = vmatpush3.msra.mxu1 %v133_v1  ;;  %v131_v6 = vld [vmem:[#allocation5 + $0x68] sm:$0xff]  ;;  %v146_v7 = vld [vmem:[#allocation5 + $0xe0] sm:$0xff]  ;;  %v145_v9 = vld [vmem:[#allocation5 + $0xd8] sm:$0xff]  ;;  %v57_v10 = vshrl.u32 %v56_v5, 7 }
  0x20   :  { %259 = vmatprep.subr.mxu0 %v148_v2  ;;  %302 = vmatprep.subr.mxu1 %v148_v2  ;;  %v130_v8 = vld [vmem:[#allocation5 + $0x60] sm:$0xff]  ;;  %v129_v11 = vld [vmem:[#allocation5 + $0x58] sm:$0xff]  ;;  %v144_v12 = vld [vmem:[#allocation5 + $0xd0] sm:$0xff] }
  0x21   :  { %260 = vmatpush3.msra.mxu0 %v132_v3  ;;  %318 = vmatpush3.msra.mxu1 %v132_v3  ;;  %v128_v13 = vld [vmem:[#allocation5 + $0x50] sm:$0xff]  ;;  %v143_v14 = vld [vmem:[#allocation5 + $0xc8] sm:$0xff]  ;;  %v62_v15 = vsub.s32 1, %v57_v10  ;;  %v58_v16 = vsub.s32 0, %v57_v10  ;;  %v54_v18 = vld [vmem:[%s463_s2] sm:$0x3] }
  0x22   :  { %261 = vmatprep.subr.mxu0 %v147_v4  ;;  %303 = vmatprep.subr.mxu1 %v147_v4  ;;  %v127_v17 = vld [vmem:[#allocation5 + $0x48] sm:$0xff]  ;;  %v142_v19 = vld [vmem:[#allocation5 + $0xc0] sm:$0xff]  ;;  %v141_v21 = vld [vmem:[#allocation5 + $0xb8] sm:$0xff]  ;;  %s412_s2 = smov [#allocation7]  }
  0x23   :  { %262 = vmatpush3.msra.mxu0 %v131_v6  ;;  %319 = vmatpush3.msra.mxu1 %v131_v6  ;;  %v126_v20 = vld [vmem:[#allocation5 + $0x40] sm:$0xff]  ;;  %v125_v22 = vld [vmem:[#allocation5 + $0x38] sm:$0xff]  ;;  %v63_v23 = vrot.slane %v54_v18, %v62_v15  ;;  %v59_v25 = vrot.slane %v54_v18, %v58_v16  ;;  %v47_v26 = vld [vmem:[#allocation2 + $0x8] sm:$0xff] }
  0x24   :  { %263 = vmatprep.subr.mxu0 %v146_v7  ;;  %304 = vmatprep.subr.mxu1 %v146_v7  ;;  %v74_v24 = vld [vmem:[%s464_s3] sm:$0x3]  ;;  %v51_v27 = vld [vmem:[#allocation2 + $0x28] sm:$0xff]  ;;  %v140_v29 = vld [vmem:[#allocation5 + $0xb0] sm:$0xff]  ;;  %s244_s3 = sshll.u32 %s412_s2, 4  ;;  %s245_s3 = int_to_ptr.vmem [resolvable:$true] %s244_s3 }
  0x25   :  { %264 = vmatpush3.msra.mxu0 %v130_v8  ;;  %320 = vmatpush3.msra.mxu1 %v130_v8  ;;  %v46_v28 = vld [vmem:[#allocation2] sm:$0xff]  ;;  %v124_v31 = vld [vmem:[#allocation5 + $0x30] sm:$0xff]  ;;  %v83_v32 = vrot.slane %v74_v24, %v62_v15  ;;  %v79_v33 = vrot.slane %v74_v24, %v58_v16  ;;  %v49_v34 = vld [vmem:[#allocation2 + $0x18] sm:$0xff]  ;;  %v67_v37 = vmul.f32 %v63_v23, %v47_v26  ;;  %s380_s5 = scalar_lea.vmem %s245_s3, 512  ;;  %p385_p11 = scmp.lt.s32.totalorder %s245_s3, %s245_s3 }
  0x26   :  { %265 = vmatprep.subr.mxu0 %v145_v9  ;;  %305 = vmatprep.subr.mxu1 %v145_v9  ;;  %v50_v30 = vld [vmem:[#allocation2 + $0x20] sm:$0xff]  ;;  %v53_v35 = vld [vmem:[#allocation2 + $0x38] sm:$0xff]  ;;  %v139_v36 = vld [vmem:[#allocation5 + $0xa8] sm:$0xff]  ;;  %v71_v38 = vmul.f32 %v63_v23, %v51_v27  ;;  %v66_v39 = vmul.f32 %v59_v25, %v46_v28  ;;  %v69_v43 = vmul.f32 %v63_v23, %v49_v34  ;;  %p381_p10 = scmp.ne.s32.totalorder %s245_s3, %s380_s5  ;;  %p386_p12 = scmp.lt.s32.totalorder %s380_s5, %s380_s5 }
  0x27   :  { %266 = vmatpush3.msra.mxu0 %v129_v11  ;;  %321 = vmatpush3.msra.mxu1 %v129_v11  ;;  %v123_v40 = vld [vmem:[#allocation5 + $0x28] sm:$0xff]  ;;  %v70_v41 = vmul.f32 %v59_v25, %v50_v30  ;;  %v138_v42 = vld [vmem:[#allocation5 + $0xa0] sm:$0xff]  ;;  %v73_v44 = vmul.f32 %v63_v23, %v53_v35  ;;  %v48_v45 = vld [vmem:[#allocation2 + $0x10] sm:$0xff]  ;;  %v87_v49 = vadd.f32 %v83_v32, %v67_v37 }
  0x28   :  { %267 = vmatprep.subr.mxu0 %v144_v12  ;;  %306 = vmatprep.subr.mxu1 %v144_v12  ;;  %v52_v46 = vld [vmem:[#allocation2 + $0x30] sm:$0xff]  ;;  %v122_v47 = vld [vmem:[#allocation5 + $0x20] sm:$0xff]  ;;  %v137_v48 = vld [vmem:[#allocation5 + $0x98] sm:$0xff]  ;;  %v91_v50 = vadd.f32 %v83_v32, %v71_v38  ;;  %v86_v51 = vadd.f32 %v79_v33, %v66_v39  ;;  %v68_v54 = vmul.f32 %v59_v25, %v48_v45  ;;  %p387_p13 = por %p386_p12, %p385_p11 }
  0x29   :  { %268 = vmatpush3.msra.mxu0 %v128_v13  ;;  %322 = vmatpush3.msra.mxu1 %v128_v13  ;;  %v121_v52 = vld [vmem:[#allocation5 + $0x18] sm:$0xff]  ;;  %v90_v53 = vadd.f32 %v79_v33, %v70_v41  ;;  %v72_v55 = vmul.f32 %v59_v25, %v52_v46  ;;  %v136_v56 = vld [vmem:[#allocation5 + $0x90] sm:$0xff]  ;;  %v89_v57 = vadd.f32 %v83_v32, %v69_v43  ;;  %v135_v60 = vld [vmem:[#allocation5 + $0x88] sm:$0xff]  ;;  %vm95_vm0 = vcmp.gt.f32.partialorder %v87_v49, 0.0 }
  0x2a   :  { %269 = vmatprep.subr.mxu0 %v143_v14  ;;  %307 = vmatprep.subr.mxu1 %v143_v14  ;;  %v93_v58 = vadd.f32 %v83_v32, %v73_v44  ;;  %v120_v59 = vld [vmem:[#allocation5 + $0x10] sm:$0xff]  ;;  %v103_v61 = vmul.f32 0.2, %v87_v49  ;;  %vm99_vm1 = vcmp.gt.f32.partialorder %v91_v50, 0.0  ;;  %v107_v62 = vmul.f32 0.2, %v91_v50  ;;  %p388_p0 = pnand %p387_p13, %p381_p10 }
  0x2b   :  { %270 = vmatpush3.msra.mxu0 %v127_v17  ;;  %323 = vmatpush3.msra.mxu1 %v127_v17  ;;  %v119_v63 = vld [vmem:[#allocation5 + $0x8] sm:$0xff]  ;;  %v134_v0 = vld [vmem:[#allocation5 + $0x80] sm:$0xff]  ;;  %v102_v1 = vmul.f32 0.2, %v86_v51  ;;  %v106_v2 = vmul.f32 0.2, %v90_v53  ;;  %v88_v3 = vadd.f32 %v79_v33, %v68_v54  ;;  %v92_v4 = vadd.f32 %v79_v33, %v72_v55 }
  0x2c   :  { %271 = vmatprep.subr.mxu0 %v142_v19  ;;  %308 = vmatprep.subr.mxu1 %v142_v19  ;;  %vm94_vm2 = vcmp.gt.f32.partialorder %v86_v51, 0.0  ;;  %vm98_vm3 = vcmp.gt.f32.partialorder %v90_v53, 0.0  ;;  %v105_v5 = vmul.f32 0.2, %v89_v57  ;;  %v109_v6 = vmul.f32 0.2, %v93_v58 }
  0x2d   :  { %272 = vmatpush3.msra.mxu0 %v126_v20  ;;  %324 = vmatpush3.msra.mxu1 %v126_v20  ;;  %v118_v7 = vld [vmem:[#allocation5] sm:$0xff]  ;;  %vm97_vm4 = vcmp.gt.f32.partialorder %v89_v57, 0.0  ;;  %vm101_vm5 = vcmp.gt.f32.partialorder %v93_v58, 0.0  ;;  %v111_v8 = vsel %vm95_vm0, %v87_v49, %v103_v61  ;;  %v115_v9 = vsel %vm99_vm1, %v91_v50, %v107_v62 }
  0x2e   :  { %273 = vmatprep.subr.mxu0 %v141_v21  ;;  %309 = vmatprep.subr.mxu1 %v141_v21  ;;  %v110_v10 = vsel %vm94_vm2, %v86_v51, %v102_v1  ;;  %v114_v11 = vsel %vm98_vm3, %v90_v53, %v106_v2  ;;  %v104_v12 = vmul.f32 0.2, %v88_v3  ;;  %v108_v13 = vmul.f32 0.2, %v92_v4 }
  0x2f   :  { %274 = vmatpush3.msra.mxu0 %v125_v22  ;;  %325 = vmatpush3.msra.mxu1 %v125_v22  ;;  %v113_v14 = vsel %vm97_vm4, %v89_v57, %v105_v5  ;;  %v117_v15 = vsel %vm101_vm5, %v93_v58, %v109_v6  ;;  %vm96_vm6 = vcmp.gt.f32.partialorder %v88_v3, 0.0  ;;  %vm100_vm7 = vcmp.gt.f32.partialorder %v92_v4, 0.0 }
  0x30   :  { %275 = vmatprep.subr.mxu0 %v140_v29  ;;  %310 = vmatprep.subr.mxu1 %v140_v29  ;;  %v112_v16 = vsel %vm96_vm6, %v88_v3, %v104_v12  ;;  %v116_v17 = vsel %vm100_vm7, %v92_v4, %v108_v13 }
  0x31   :  { %276 = vmatpush3.msra.mxu0 %v124_v31  ;;  %326 = vmatpush3.msra.mxu1 %v124_v31 }
  0x32   :  { %277 = vmatprep.subr.mxu0 %v139_v36  ;;  %311 = vmatprep.subr.mxu1 %v139_v36 }
  0x33   :  { %278 = vmatpush3.msra.mxu0 %v123_v40  ;;  %327 = vmatpush3.msra.mxu1 %v123_v40 }
  0x34   :  { %279 = vmatprep.subr.mxu0 %v138_v42  ;;  %312 = vmatprep.subr.mxu1 %v138_v42 }
  0x35   :  { %280 = vmatpush3.msra.mxu0 %v122_v47  ;;  %328 = vmatpush3.msra.mxu1 %v122_v47 }
  0x36   :  { %281 = vmatprep.subr.mxu0 %v137_v48  ;;  %313 = vmatprep.subr.mxu1 %v137_v48 }
  0x37   :  { %282 = vmatpush3.msra.mxu0 %v121_v52  ;;  %329 = vmatpush3.msra.mxu1 %v121_v52 }
  0x38   :  { %283 = vmatprep.subr.mxu0 %v136_v56  ;;  %314 = vmatprep.subr.mxu1 %v136_v56 }
  0x39   :  { %284 = vmatpush3.msra.mxu0 %v120_v59  ;;  %330 = vmatpush3.msra.mxu1 %v120_v59 }
  0x3a   :  { %285 = vmatprep.subr.mxu0 %v135_v60  ;;  %315 = vmatprep.subr.mxu1 %v135_v60 }
  0x3b   :  { %286 = vmatpush3.msra.mxu0 %v119_v63  ;;  %331 = vmatpush3.msra.mxu1 %v119_v63 }
  0x3c   :  { %287 = vmatprep.subr.mxu0 %v134_v0  ;;  %316 = vmatprep.subr.mxu1 %v134_v0 }
  0x3d   :  { %288 = vmatpush3.msra.mxu0 %v118_v7  ;;  %332 = vmatpush3.msra.mxu1 %v118_v7 }
  0x3e   :  { %214 = vmatprep.mubr.f32.mxu0 %v111_v8  ;;  %224 = vmatprep.mubr.f32.mxu1 %v115_v9 }
  0x3f   :  { %215 = vmatmul.mubr.f32.vlgmr.msra.gmra.mxu0 %v110_v10  ;;  %225 = vmatmul.mubr.f32.vlgmr.msra.gmra.mxu1 %v114_v11 }
  0x40   :  { %219 = vmatprep.mubr.f32.mxu0 %v113_v14  ;;  %229 = vmatprep.mubr.f32.mxu1 %v117_v15 }
  0x43   :  { %220 = vmatmul.mubr.f32.gmra.mxu0 %v112_v16  ;;  %230 = vmatmul.mubr.f32.gmra.mxu1 %v116_v17 }
  0xff   :  { %v289_v18 = vpop.f32.mrf.mxu0  ;;  %v295_v19 = vpop.f32.mrf.mxu1 }
 0x101   :  { %v290_v20 = vpop.f32.mrf.mxu0  ;;  %v296_v21 = vpop.f32.mrf.mxu1 }
 0x102   :  { %v291_v22 = vadd.f32 %v290_v20, %v289_v18  ;;  %v297_v23 = vadd.f32 %v296_v21, %v295_v19 }
 0x103   :  { %v292_v24 = vpop.f32.mrf.mxu0  ;;  %v298_v25 = vpop.f32.mrf.mxu1 }
 0x104   :  { %235 = vst [vmem:[#allocation7] sm:$0xff] %v291_v22  ;;  %237 = vst [vmem:[#allocation7 + $0x10] sm:$0xff] %v297_v23 }
 0x105   :  { %v293_v26 = vpop.f32.mrf.mxu0  ;;  %v299_v27 = vpop.f32.mrf.mxu1 }
 0x106   :  { %v294_v28 = vadd.f32 %v293_v26, %v292_v24  ;;  %v300_v29 = vadd.f32 %v299_v27, %v298_v25 }
 0x108   :  { %236 = vst [vmem:[#allocation7 + $0x8] sm:$0xff] %v294_v28  ;;  %238 = vst [vmem:[#allocation7 + $0x18] sm:$0xff] %v300_v29 }
 0x109   :  { %391 = shalt.err (!%p388_p0)
}
 0x10a   :  { %250 = dma.vmem_to_hbm [thread:$0]  %s245_s3, 512, %s465_s4, [#allocation4], %s410_s25, %s410_s25, %s411_s26  }
 0x10b   :  { %404 = dma.done.wait [#allocation4], 512  }
 0x10c   :  { %405 = vsyncadd [#allocation4], 4294966784 }
 0x10d   :  { %254 = vsyncpa [#allocation3], 1 }
 0x10e   :  { %255 = vsyncpa [#allocation6], 1 }
 0x10f   :  { %256 = vsyncpa [#allocation4], 1 }

</bundles_post_ra>
